<compile_context>
chip_gen: v6e
topology: v6e:2x2x1
jax: 0.10.0
libtpu: 0.0.40
codegen_flags: <defaults>
</compile_context>

<pallas_src>
import jax
import jax.numpy as jnp
from jax.experimental import pallas as pl
from jax.experimental.pallas import tpu as pltpu


def _se_kernel(x_ref, w1_ref, b1_ref, w2_ref, b2_ref, o_ref):
    # x_ref: (1, C, HW) block for one batch element (C on sublanes, HW on lanes)
    x = x_ref[0]                                        # (C, HW)
    hw = x.shape[1]

    # Squeeze: global average pool over spatial, routed through the MXU.
    # 1/HW is folded into the "ones" vector so no divide is needed.
    pool_vec = jnp.full((hw, 1), 1.0 / hw, dtype=jnp.float32)
    pooled = jnp.dot(x, pool_vec,
                     preferred_element_type=jnp.float32)        # (C, 1)

    # 1x1 conv "squeeze" (conv weight layout (Ch, C)): (Ch,C) @ (C,1) + b1, ReLU
    h = jnp.dot(w1_ref[...], pooled,
                preferred_element_type=jnp.float32) + b1_ref[...]
    h = jnp.maximum(h, 0.0)                                     # (Ch, 1)

    # 1x1 conv "excite" (conv weight layout (C, Ch)): (C,Ch) @ (Ch,1) + b2
    a = jnp.dot(w2_ref[...], h,
                preferred_element_type=jnp.float32) + b2_ref[...]

    # HardSigmoid (this module's variant): clamp(a + 0.5, 0, 1)
    a = jnp.clip(a + 0.5, 0.0, 1.0)                             # (C, 1)

    # Excite: broadcast the per-channel gate over the lane (spatial) axis.
    o_ref[0] = (x * a).astype(o_ref.dtype)                      # (C, HW)


def se_block(x_nchw, w_squeeze, b_squeeze, w_excite, b_excite):
    """SEBlock forward.

    x_nchw:    (N, C, H, W) float32
    w_squeeze: (Ch, C)  — Conv2d(C, Ch, 1) weight, (out_ch, in_ch) layout
    b_squeeze: (Ch,)
    w_excite:  (C, Ch)  — Conv2d(Ch, C, 1) weight
    b_excite:  (C,)
    """
    N, C, H, W = x_nchw.shape
    Ch = w_squeeze.shape[0]
    HW = H * W

    # NCHW -> (N, C, HW): purely a view of contiguous memory (no data movement).
    x = x_nchw.reshape(N, C, HW)
    b1_2d = b_squeeze.reshape(Ch, 1)
    b2_2d = b_excite.reshape(C, 1)

    # Advisory cost estimate: this op is memory-bound and tiny.
    itemsize = 4
    bytes_accessed = 2 * N * C * HW * itemsize + (2 * Ch * C + Ch + C) * itemsize
    flops = N * (2 * C * HW            # pooling matmul
                 + 2 * Ch * C * 2      # two 1x1-conv matmuls
                 + C * HW)             # excite multiply
    cost = pl.CostEstimate(flops=flops, transcendentals=0,
                           bytes_accessed=bytes_accessed)

    out = pl.pallas_call(
        _se_kernel,
        out_shape=jax.ShapeDtypeStruct((N, C, HW), x.dtype),
        grid_spec=pltpu.PrefetchScalarGridSpec(
            num_scalar_prefetch=0,
            grid=(N,),
            in_specs=[
                pl.BlockSpec((1, C, HW), lambda n: (n, 0, 0)),
                pl.BlockSpec((Ch, C), lambda n: (0, 0)),
                pl.BlockSpec((Ch, 1), lambda n: (0, 0)),
                pl.BlockSpec((C, Ch), lambda n: (0, 0)),
                pl.BlockSpec((C, 1), lambda n: (0, 0)),
            ],
            out_specs=pl.BlockSpec((1, C, HW), lambda n: (n, 0, 0)),
        ),
        compiler_params=pltpu.CompilerParams(
            dimension_semantics=("parallel",)),
        cost_estimate=cost,
    )(x, w_squeeze, b1_2d, w_excite, b2_2d)

    # (N, C, HW) -> NCHW: free reshape again, no transpose.
    return out.reshape(N, C, H, W)


def _reference(x_nchw, w_squeeze, b_squeeze, w_excite, b_excite):
    # Pure-JAX reference of the PyTorch forward (weights in (out, in) layout).
    pooled = jnp.mean(x_nchw, axis=(2, 3))                         # (N, C)
    h = jnp.maximum(pooled @ w_squeeze.T + b_squeeze, 0.0)         # (N, Ch)
    a = h @ w_excite.T + b_excite                                  # (N, C)
    a = jnp.clip(a + 0.5, 0.0, 1.0)
    return x_nchw * a[:, :, None, None]


if __name__ == "__main__":
    # Module config: in_ch=32, reduction=4 -> hidden=8 ; input 2x32x16x16
    N, C, H, W = 2, 32, 16, 16
    reduction = 4
    Ch = C // reduction

    key = jax.random.PRNGKey(0)
    kx, k1, kb1, k2, kb2 = jax.random.split(key, 5)

    x = jax.random.normal(kx, (N, C, H, W), dtype=jnp.float32)

    # Deterministic synthetic weights (PyTorch Conv2d (out_ch, in_ch) layout):
    # squeeze conv: Conv2d(C, Ch, 1) -> (Ch, C); kaiming (fan_in = C)
    w1 = jax.random.normal(k1, (Ch, C), dtype=jnp.float32) * jnp.sqrt(2.0 / C)
    b1 = jax.random.uniform(kb1, (Ch,), dtype=jnp.float32,
                            minval=-1.0 / jnp.sqrt(C), maxval=1.0 / jnp.sqrt(C))
    # excite conv: Conv2d(Ch, C, 1) -> (C, Ch); xavier
    w2 = jax.random.normal(k2, (C, Ch), dtype=jnp.float32) * jnp.sqrt(2.0 / (Ch + C))
    b2 = jax.random.uniform(kb2, (C,), dtype=jnp.float32,
                            minval=-1.0 / jnp.sqrt(Ch), maxval=1.0 / jnp.sqrt(Ch))

    out = se_block(x, w1, b1, w2, b2)
    jax.block_until_ready(out)

    ref = _reference(x, w1, b1, w2, b2)
    assert out.shape == x.shape and out.dtype == x.dtype
    assert jnp.allclose(out, ref, atol=1e-5, rtol=1e-5), "mismatch vs reference"

    print("KERNEL_OK")
</pallas_src>

<mosaic_0001>
module attributes {stable_mosaic.version = 11 : i64} {
  func.func @_se_kernel(%arg0: i32, %arg1: memref<1x32x256xf32, #tpu.memory_space<vmem>>, %arg2: memref<8x32xf32, #tpu.memory_space<vmem>>, %arg3: memref<8x1xf32, #tpu.memory_space<vmem>>, %arg4: memref<32x8xf32, #tpu.memory_space<vmem>>, %arg5: memref<32x1xf32, #tpu.memory_space<vmem>>, %arg6: memref<1x32x256xf32, #tpu.memory_space<vmem>>) attributes {dimension_semantics = [#tpu.dimension_semantics<parallel>], iteration_bounds = array<i64: 2>, scalar_prefetch = 0 : i64, scratch_operands = 0 : i64, tpu.core_type = #tpu.core_type<tc>, window_params = [{transform_indices = @transform_0, window_bounds = array<i64: 1, 32, 256>}, {pipeline_mode = #tpu.pipeline_mode<synchronous>, transform_indices = @transform_1, window_bounds = array<i64: 8, 32>}, {pipeline_mode = #tpu.pipeline_mode<synchronous>, transform_indices = @transform_2, window_bounds = array<i64: 8, 1>}, {pipeline_mode = #tpu.pipeline_mode<synchronous>, transform_indices = @transform_3, window_bounds = array<i64: 32, 8>}, {pipeline_mode = #tpu.pipeline_mode<synchronous>, transform_indices = @transform_4, window_bounds = array<i64: 32, 1>}, {transform_indices = @transform_5, window_bounds = array<i64: 1, 32, 256>}]} {
    %c0 = arith.constant 0 : index
    %c0_0 = arith.constant 0 : index
    %c0_1 = arith.constant 0 : index
    %0 = vector.load %arg1[%c0, %c0_0, %c0_1] : memref<1x32x256xf32, #tpu.memory_space<vmem>>, vector<1x32x256xf32>
    %1 = vector.shape_cast %0 : vector<1x32x256xf32> to vector<32x256xf32>
    %cst = arith.constant 3.906250e-03 : f32
    %2 = vector.broadcast %cst : f32 to vector<256x1xf32>
    %cst_2 = arith.constant dense<0.000000e+00> : vector<32x1xf32>
    %3 = tpu.matmul %1, %2, %cst_2 {dimension_numbers = #tpu.dot_dimension_numbers<[1], [0], [0], [1], [0, 0, 1, 1], [], []>} : vector<32x256xf32>, vector<256x1xf32>, vector<32x1xf32> -> vector<32x1xf32>
    %c0_3 = arith.constant 0 : index
    %c0_4 = arith.constant 0 : index
    %4 = vector.load %arg2[%c0_3, %c0_4] : memref<8x32xf32, #tpu.memory_space<vmem>>, vector<8x32xf32>
    %cst_5 = arith.constant dense<0.000000e+00> : vector<8x1xf32>
    %5 = tpu.matmul %4, %3, %cst_5 {dimension_numbers = #tpu.dot_dimension_numbers<[1], [0], [0], [1], [0, 0, 1, 1], [], []>} : vector<8x32xf32>, vector<32x1xf32>, vector<8x1xf32> -> vector<8x1xf32>
    %c0_6 = arith.constant 0 : index
    %c0_7 = arith.constant 0 : index
    %6 = vector.load %arg3[%c0_6, %c0_7] : memref<8x1xf32, #tpu.memory_space<vmem>>, vector<8x1xf32>
    %7 = arith.addf %5, %6 : vector<8x1xf32>
    %cst_8 = arith.constant 0.000000e+00 : f32
    %8 = vector.broadcast %cst_8 : f32 to vector<8x1xf32>
    %9 = arith.maximumf %7, %8 : vector<8x1xf32>
    %c0_9 = arith.constant 0 : index
    %c0_10 = arith.constant 0 : index
    %10 = vector.load %arg4[%c0_9, %c0_10] : memref<32x8xf32, #tpu.memory_space<vmem>>, vector<32x8xf32>
    %cst_11 = arith.constant dense<0.000000e+00> : vector<32x1xf32>
    %11 = tpu.matmul %10, %9, %cst_11 {dimension_numbers = #tpu.dot_dimension_numbers<[1], [0], [0], [1], [0, 0, 1, 1], [], []>} : vector<32x8xf32>, vector<8x1xf32>, vector<32x1xf32> -> vector<32x1xf32>
    %c0_12 = arith.constant 0 : index
    %c0_13 = arith.constant 0 : index
    %12 = vector.load %arg5[%c0_12, %c0_13] : memref<32x1xf32, #tpu.memory_space<vmem>>, vector<32x1xf32>
    %13 = arith.addf %11, %12 : vector<32x1xf32>
    %cst_14 = arith.constant 5.000000e-01 : f32
    %14 = vector.broadcast %cst_14 : f32 to vector<32x1xf32>
    %15 = arith.addf %13, %14 : vector<32x1xf32>
    %cst_15 = arith.constant 0.000000e+00 : f32
    %cst_16 = arith.constant 1.000000e+00 : f32
    %16 = vector.broadcast %cst_15 : f32 to vector<32x1xf32>
    %17 = arith.maximumf %16, %15 : vector<32x1xf32>
    %18 = vector.broadcast %cst_16 : f32 to vector<32x1xf32>
    %19 = arith.minimumf %18, %17 : vector<32x1xf32>
    %20 = vector.broadcast %19 : vector<32x1xf32> to vector<32x256xf32>
    %21 = arith.mulf %1, %20 : vector<32x256xf32>
    %c0_17 = arith.constant 0 : index
    %c0_18 = arith.constant 0 : index
    %c0_19 = arith.constant 0 : index
    %22 = vector.load %arg6[%c0_17, %c0_18, %c0_19] : memref<1x32x256xf32, #tpu.memory_space<vmem>>, vector<1x32x256xf32>
    %23 = vector.shape_cast %22 : vector<1x32x256xf32> to vector<32x256xf32>
    %24 = vector.shape_cast %21 : vector<32x256xf32> to vector<1x32x256xf32>
    tpu.vector_store %arg6[%c0_17, %c0_18, %c0_19], %24 {strides = array<i32>} : memref<1x32x256xf32, #tpu.memory_space<vmem>>, vector<1x32x256xf32>,
    return
  }
  func.func @transform_0(%arg0: i32) -> (i32, i32, i32) {
    %c0_i32 = arith.constant 0 : i32
    %c0_i32_0 = arith.constant 0 : i32
    %c0_i32_1 = arith.constant 0 : i32
    return %arg0, %c0_i32, %c0_i32_0 : i32, i32, i32
  }
  func.func @transform_1(%arg0: i32) -> (i32, i32) {
    %c0_i32 = arith.constant 0 : i32
    %c0_i32_0 = arith.constant 0 : i32
    %c0_i32_1 = arith.constant 0 : i32
    return %c0_i32, %c0_i32_0 : i32, i32
  }
  func.func @transform_2(%arg0: i32) -> (i32, i32) {
    %c0_i32 = arith.constant 0 : i32
    %c0_i32_0 = arith.constant 0 : i32
    %c0_i32_1 = arith.constant 0 : i32
    return %c0_i32, %c0_i32_0 : i32, i32
  }
  func.func @transform_3(%arg0: i32) -> (i32, i32) {
    %c0_i32 = arith.constant 0 : i32
    %c0_i32_0 = arith.constant 0 : i32
    %c0_i32_1 = arith.constant 0 : i32
    return %c0_i32, %c0_i32_0 : i32, i32
  }
  func.func @transform_4(%arg0: i32) -> (i32, i32) {
    %c0_i32 = arith.constant 0 : i32
    %c0_i32_0 = arith.constant 0 : i32
    %c0_i32_1 = arith.constant 0 : i32
    return %c0_i32, %c0_i32_0 : i32, i32
  }
  func.func @transform_5(%arg0: i32) -> (i32, i32, i32) {
    %c0_i32 = arith.constant 0 : i32
    %c0_i32_0 = arith.constant 0 : i32
    %c0_i32_1 = arith.constant 0 : i32
    return %arg0, %c0_i32, %c0_i32_0 : i32, i32, i32
  }
}

</mosaic_0001>

<bundles_post_ra>
// kernel: tpu_custom_call.1
= control target key start
LH: loop header
LB: loop body
LE: loop exit
PB: predicated region body
PF: predicated region fallthrough
CT: control target
= control target key end

     0   :  { %10 = vsyncpa [#allocation3], 0  ;;  %s1168_s0 = inlined_call_operand.hbm [shape: f32[2,32,256], index: 0, kind: input, shape index: {}]   ;;  %s1169_s1 = inlined_call_operand.vmem [shape: f32[8,32], index: 1, kind: input, shape index: {}]   ;;  %s1170_s2 = inlined_call_operand.vmem [shape: f32[8,1], index: 2, kind: input, shape index: {}]   ;;  %s1171_s3 = inlined_call_operand.vmem [shape: f32[32,8], index: 3, kind: input, shape index: {}]   ;;  %s1172_s4 = inlined_call_operand.vmem [shape: f32[32,1], index: 4, kind: input, shape index: {}]   ;;  %s1173_s5 = inlined_call_operand.hbm [shape: f32[2,32,256], index: 5, kind: output, shape index: {}]  }
   0x1   :  { %12 = vsyncpa [#allocation3 + $0x1], 0 }
   0x2   :  { %13 = vsyncpa [#allocation4], 0 }
   0x3   :  { %15 = vsyncpa [#allocation4 + $0x1], 0  ;;  %s938_s18 = smov 0   ;;  %s940_s19 = smov 0  }
   0x4   :  { %s942_s20 = smov 0   ;;  %s944_s21 = smov 0  }
   0x5 LB: > { %s959_s22 = sadd.s32 4294967295, %s896_s21   ;;  %s654_s23 = sadd.s32 4294967294, %s896_s21   ;;  %s896_s21 = sphi %s944_s21, %s1188_s21   ;;  %s892_s20 = sphi %s942_s20, %s1187_s20   ;;  %s888_s19 = sphi %s940_s19, %s1186_s19   ;;  %s884_s18 = sphi %s938_s18, %s1185_s18  }
   0x6   : > { %s963_s24 = sadd.s32 1, %s896_s21   ;;  %s28_s25 = sadd.s32 1, %s892_s20 }
   0x7   : > { %s25_s26 = ssub.s32 %s896_s21, %s963_s24  ;;  %p35_p0 = scmp.ne.s32.totalorder %s892_s20, %s888_s19 }
   0x8   : > { %p26_p1 = scmp.eq.s32.totalorder %s25_s26, 0  ;;  %p36_p2 = scmp.eq.s32.totalorder %s896_s21, 0 }
   0x9   : > { %p41_p3 = scmp.ne.s32.totalorder %s888_s19, %s884_s18  ;;  %p42_p4 = scmp.eq.s32.totalorder %s959_s22, 0 }
   0xa   : > { %s975_s27 = scalar_select %p26_p1, %s892_s20, %s28_s25  }
   0xb   : > { %p977_p5 = por %p36_p2, %p35_p0  ;;  %p981_p6 = por %p42_p4, %p41_p3 }
   0xc   : > { %p149_p7 = scmp.eq.s32.totalorder %s959_s22, 1  ;;  %p155_p8 = scmp.eq.s32.totalorder %s654_s23, 1 }
   0xd   : > { %s1177_s29 = scalar_select %p981_p6, 1, 0 }
   0xe   : > { %p760_p10 = scmp.lt.s32.totalorder %s896_s21, 2  ;;  %p988_p11 = por %p149_p7, %p35_p0 }
   0xf   : > { %p992_p12 = por %p155_p8, %p41_p3  ;;  %s187_s7 = sand.u32 1, %s892_s20  }
  0x10   : > { %s1178_s30 = scalar_select %p988_p11, 1, 0 }
  0x11   : > { %s1179_s6 = scalar_select %p992_p12, 1, 0 }
  0x12   : > { %s673_s8 = sshll.u32 %s896_s21, 10  ;;  %s657_s9 = sshll.u32 %s187_s7, 6 }
  0x13   : > { %s1001_s12 = scalar_lea.hbm %s1168_s0, %s673_s8  ;;  %s191_s13 = scalar_lea.vmem [#allocation2], %s657_s9 }
  0x14   : > { %s198_s14 = sshll.u32 %s191_s13, 4  ;;  %p1005_p13 = pnand %p760_p10, %p977_p5  ;;  %s1009_s14 = int_to_ptr.vmem [resolvable:$true] %s198_s14 }
  0x15   : > { %s1011_s16 = scalar_lea.sflag [#allocation3], %s187_s7  ;;  %s804_s17 = scalar_lea.hbm %s1001_s12, 1024 }
  0x16   : > { %p805_p0 = scmp.ne.s32.totalorder %s1001_s12, %s804_s17  ;;  %p806_p1 = pneg %p1005_p13 }
  0x17   : > { %s809_s26 = scalar_lea.hbm %s1168_s0, 2048  ;;  %p810_p4 = scmp.lt.s32.totalorder %s1001_s12, %s1168_s0 }
  0x18   : > { %p807_p2 = pnand %p806_p1, %p805_p0  ;;  %p811_p5 = scmp.lt.s32.totalorder %s809_s26, %s804_s17 }
  0x1a   : > { %p808_p3 = pneg %p807_p2  ;;  %p812_p7 = por %p811_p5, %p810_p4 }
  0x1c   : > { %p813_p8 = pnand %p812_p7, %p808_p3 }
  0x1e   : > { %816 = shalt.err (!%p813_p8)
}
  0x1f   : > { %s817_s7 = scalar_lea.vmem %s1009_s14, 1024  ;;  %s898_s9 = smov [#allocation2]  }
  0x20   : > { %p818_p10 = scmp.ne.s32.totalorder %s1009_s14, %s817_s7  ;;  %s822_s10 = sshll.u32 %s898_s9, 4  ;;  %s823_s10 = int_to_ptr.vmem [resolvable:$false] %s822_s10 }
  0x21   : > { %s824_s11 = scalar_lea.vmem %s823_s10, 2048  ;;  %p825_p2 = scmp.lt.s32.totalorder %s1009_s14, %s823_s10 }
  0x22   : > { %p820_p9 = pnand %p818_p10, %p806_p1  ;;  %p826_p12 = scmp.lt.s32.totalorder %s824_s11, %s817_s7 }
  0x24   : > { %p821_p0 = pneg %p820_p9  ;;  %p827_p11 = por %p826_p12, %p825_p2 }
  0x26   : > { %p828_p6 = pnand %p827_p11, %p821_p0 }
  0x28   : > { %831 = shalt.err (!%p828_p6)
}
  0x29   : > { %s899_s13 = smov 256   ;;  %s900_s17 = smov 16  }
  0x2a   : > { %755 = dma.hbm_to_vmem [thread:$0]  (!%p1005_p13), %s1001_s12, 1024, %s1009_s14, %s1011_s16, %s899_s13, %s899_s13, %s900_s17  }
  0x2b   : > { %p660_p9 = scmp.ge.s32.totalorder %s896_s21, 1  ;;  %p206_p1 = scmp.lt.s32.totalorder %s896_s21, 3 }
  0x2d   : > { %p207_p3 = pnand %p660_p9, %p206_p1 }
  0x2e   : > { %s1035_s23 = sand.u32 (!%p207_p3), 1, %s888_s19   ;;  %p1181_p6 = scmp.ne.s32.totalorder (!%p207_p3), %s1177_s29, 0 }
  0x2f   : > { %210 = sbr.rel (%p207_p3) target bundleno = 852 (0x354), region = 40  ;;  %s661_s25 = sshll.u32 (!%p207_p3), %s1035_s23, 6 }
  0x30   : > { %s213_s26 = scalar_lea.sflag (!%p207_p3), [#allocation3], %s1035_s23  ;;  %s1041_s28 = scalar_lea.vmem (!%p207_p3), [#allocation2], %s661_s25 }
  0x34   : > { %875 = dma.done.wait (%p1181_p6), %s213_s26, 1024  }
  0x35   : > { %877 = vsyncadd (%p1181_p6), %s213_s26, 4294966272  ;;  %v901_v0 = vmov 0.00390625   ;;  %v1048_v1 = vld [vmem:[%s1041_s28 + $0x8] sm:$0xff]  ;;  %v1052_v2 = vld [vmem:[%s1041_s28] sm:$0xff]  ;;  %v902_v9 = vmov 0.0   ;;  %vm903_vm0 = vmmov 0  }
  0x36   : > { %675 = vmatprep.subr.mxu0 %v901_v0  ;;  %315 = vmatprep.mubr.f32.mxu0 %v1048_v1  ;;  %v1055_v3 = vld [vmem:[%s1041_s28 + $0x18] sm:$0xff]  ;;  %v1060_v4 = vld [vmem:[%s1041_s28 + $0x10] sm:$0xff]  ;;  %v1063_v5 = vld [vmem:[%s1041_s28 + $0x28] sm:$0xff]  ;;  %vm338_vm1 = vcmask 261120   ;;  %vm421_vm2 = vcmask 64512   ;;  %v904_v32 = vmov 0  }
  0x37   : > { %676 = vmatpush3.msra.mxu0 %v901_v0  ;;  %v1068_v6 = vld [vmem:[%s1041_s28 + $0x20] sm:$0xff]  ;;  %v1071_v7 = vld [vmem:[%s1041_s28 + $0x38] sm:$0xff]  ;;  %v1076_v8 = vld [vmem:[%s1041_s28 + $0x30] sm:$0xff]  ;;  %729 = vmatprep.subr.mxu1 %v902_v9  ;;  %s242_s7 = scalar_lea.vmem [#allocation5], %s661_s25  ;;  %s674_s10 = sshll.u32 %s959_s22, 10 }
  0x38   : > { %677 = vmatprep.subr.mxu0 %v901_v0  ;;  %737 = vmatprep.mubr.msk.f32.mxu1 %vm903_vm0, %v902_v9  ;;  %v336_v22 = vld [vmem:[%s1169_s1] sm:$0xff]  ;;  %v414_v29 = vld [vmem:[%s1171_s3 + $0x8] sm:$0xff]  ;;  %v415_v30 = vld [vmem:[%s1171_s3 + $0x10] sm:$0xff]  ;;  %s581_s9 = sshll.u32 %s242_s7, 4  ;;  %s1123_s13 = scalar_lea.hbm %s1173_s5, %s674_s10  ;;  %s1118_s9 = int_to_ptr.vmem [resolvable:$true] %s581_s9 }
  0x39   : > { %678 = vmatpush3.msra.mxu0 %v901_v0  ;;  %v413_v23 = vld [vmem:[%s1171_s3] sm:$0xff]  ;;  %v416_v31 = vld [vmem:[%s1171_s3 + $0x18] sm:$0xff]  ;;  %802 = vset.pattern.permute.xlu0 %v904_v32  ;;  %v418_v33 = vld [vmem:[%s1172_s4 + $0x8] sm:$0xff]  ;;  %s568_s22 = scalar_lea.sflag [#allocation4], %s1035_s23  ;;  %s832_s17 = scalar_lea.vmem %s1118_s9, 1024 }
  0x3a   : > { %679 = vmatprep.subr.mxu0 %v901_v0  ;;  %v337_v24 = vld [vmem:[%s1170_s2] sm:$0xff]  ;;  %803 = vset.pattern.permute.xlu1 %v904_v32  ;;  %v420_v38 = vld [vmem:[%s1172_s4 + $0x18] sm:$0xff]  ;;  %v419_v41 = vld [vmem:[%s1172_s4 + $0x10] sm:$0xff]  ;;  %p833_p11 = scmp.ne.s32.totalorder %s1118_s9, %s832_s17  ;;  %p1182_p12 = scmp.ne.s32.totalorder %s1178_s30, 0 }
  0x3b   : > { %680 = vmatpush3.msra.mxu0 %v901_v0  ;;  %v417_v35 = vld [vmem:[%s1172_s4] sm:$0xff]  ;;  %s905_s26 = smov [#allocation5]  }
  0x3c   : > { %681 = vmatprep.subr.mxu0 %v901_v0  ;;  %p834_p13 = pnand %p833_p11, %p1182_p12  ;;  %s836_s28 = sshll.u32 %s905_s26, 4  ;;  %s837_s28 = int_to_ptr.vmem [resolvable:$false] %s836_s28 }
  0x3d   : > { %682 = vmatpush3.msra.mxu0 %v901_v0  ;;  %s838_s29 = scalar_lea.vmem %s837_s28, 2048  ;;  %p839_p5 = scmp.lt.s32.totalorder %s1118_s9, %s837_s28 }
  0x3e   : > { %683 = vmatprep.subr.mxu0 %v901_v0  ;;  %p835_p4 = pneg %p834_p13  ;;  %p840_p7 = scmp.lt.s32.totalorder %s838_s29, %s832_s17 }
  0x3f   : > { %684 = vmatpush3.msra.mxu0 %v901_v0 }
  0x40   : > { %685 = vmatprep.subr.mxu0 %v901_v0  ;;  %p841_p8 = por %p840_p7, %p839_p5 }
  0x41   : > { %686 = vmatpush3.msra.mxu0 %v901_v0 }
  0x42   : > { %687 = vmatprep.subr.mxu0 %v901_v0  ;;  %p842_p10 = pnand %p841_p8, %p835_p4 }
  0x43   : > { %688 = vmatpush3.msra.mxu0 %v901_v0 }
  0x44   : > { %689 = vmatprep.subr.mxu0 %v901_v0 }
  0x45   : > { %690 = vmatpush3.msra.mxu0 %v901_v0 }
  0x46   : > { %691 = vmatprep.subr.mxu0 %v901_v0 }
  0x47   : > { %692 = vmatpush3.msra.mxu0 %v901_v0 }
  0x48   : > { %693 = vmatprep.subr.mxu0 %v901_v0 }
  0x49   : > { %694 = vmatpush3.msra.mxu0 %v901_v0 }
  0x4a   : > { %695 = vmatprep.subr.mxu0 %v901_v0 }
  0x4b   : > { %696 = vmatpush3.msra.mxu0 %v901_v0 }
  0x4c   : > { %697 = vmatprep.subr.mxu0 %v901_v0 }
  0x4d   : > { %698 = vmatpush3.msra.mxu0 %v901_v0 }
  0x4e   : > { %699 = vmatprep.subr.mxu0 %v901_v0 }
  0x4f   : > { %700 = vmatpush3.msra.mxu0 %v901_v0 }
  0x50   : > { %701 = vmatprep.subr.mxu0 %v901_v0 }
  0x51   : > { %702 = vmatpush3.msra.mxu0 %v901_v0 }
  0x52   : > { %703 = vmatprep.subr.mxu0 %v901_v0 }
  0x53   : > { %704 = vmatpush3.msra.mxu0 %v901_v0 }
  0x54   : > { %705 = vmatprep.subr.mxu0 %v901_v0 }
  0x55   : > { %706 = vmatpush3.msra.mxu0 %v901_v0 }
  0x56   : > { %316 = vmatmul.mubr.f32.vlgmr.msra.gmra.mxu0 %v1052_v2 }
  0x57   : > { %320 = vmatprep.mubr.f32.mxu0 %v1055_v3 }
  0x5a   : > { %321 = vmatmul.mubr.f32.gmra.mxu0 %v1060_v4 }
  0x5b   : > { %325 = vmatprep.mubr.f32.mxu0 %v1063_v5 }
  0x5e   : > { %326 = vmatmul.mubr.f32.gmra.mxu0 %v1068_v6 }
  0x5f   : > { %330 = vmatprep.mubr.f32.mxu0 %v1071_v7 }
  0x62   : > { %331 = vmatmul.mubr.f32.gmra.mxu0 %v1076_v8 }
 0x116   : > { %v707_v10 = vpop.f32.mrf.mxu0 }
 0x118   : > { %v708_v11 = vpop.f32.mrf.mxu0 }
 0x119   : > { %v709_v21 = vadd.f32 %v708_v11, %v707_v10 }
 0x11a   : > { %v710_v12 = vpop.f32.mrf.mxu0 }
 0x11c   : > { %v711_v13 = vpop.f32.mrf.mxu0 }
 0x11d   : > { %v712_v20 = vadd.f32 %v711_v13, %v710_v12 }
 0x11e   : > { %v713_v14 = vpop.f32.mrf.mxu0 }
 0x120   : > { %v714_v15 = vpop.f32.mrf.mxu0 }
 0x121   : > { %v715_v19 = vadd.f32 %v714_v15, %v713_v14 }
 0x122   : > { %v716_v16 = vpop.f32.mrf.mxu0 }
 0x124   : > { %v717_v17 = vpop.f32.mrf.mxu0 }
 0x125   : > { %v718_v18 = vadd.f32 %v717_v17, %v716_v16 }
 0x127   : > { %730 = vmatpush3.msra.mxu1 %v718_v18 }
 0x128   : > { %731 = vmatprep.subr.mxu1 %v902_v9 }
 0x129   : > { %732 = vmatpush3.msra.mxu1 %v715_v19 }
 0x12a   : > { %733 = vmatprep.subr.mxu1 %v902_v9 }
 0x12b   : > { %734 = vmatpush3.msra.mxu1 %v712_v20 }
 0x12c   : > { %735 = vmatprep.subr.mxu1 %v902_v9 }
 0x12d   : > { %736 = vmatpush3.msra.mxu1 %v709_v21 }
 0x12e   : > { %738 = vmatmul.mubr.msk.f32.vlgmr.msra.gmra.mxu1 %vm338_vm1, %v336_v22 }
 0x12f   : > { %742 = vmatprep.mubr.msk.f32.mxu1 %vm421_vm2, %v413_v23 }
 0x1ee   : > { %v408_v25 = vpop.f32.mrf.mxu1 }
 0x1ef   : > { %v409_v26 = vadd.f32 %v408_v25, %v337_v24 }
 0x1f0   : > { %v739_v27 = vpop.f32.mrf.mxu1 }
 0x1f1   : > { %v412_v28 = vmax.f32 %v409_v26, 0.0 }
 0x1f3   : > { %740 = vmatprep.subr.mxu1 %v412_v28 }
 0x1f4   : > { %741 = vmatpush3.msra.mxu1 %v412_v28 }
 0x1f5   : > { %743 = vmatmul.mubr.msk.f32.vlgmr.msra.gmra.mxu1 %vm421_vm2, %v414_v29 }
 0x1f6   : > { %745 = vmatprep.mubr.msk.f32.mxu1 %vm421_vm2, %v415_v30 }
 0x1f9   : > { %746 = vmatmul.mubr.msk.f32.gmra.mxu1 %vm421_vm2, %v416_v31 }
 0x2b5   : > { %v744_v34 = vpop.f32.mrf.mxu1 }
 0x2b6   : > { %v506_v36 = vadd.f32 %v744_v34, %v418_v33 }
 0x2b7   : > { %v500_v37 = vpop.f32.mrf.mxu1 }
 0x2b8   : > { %v501_v39 = vadd.f32 %v500_v37, %v417_v35  ;;  %v520_v42 = vadd.f32 0.5, %v506_v36 }
 0x2b9   : > { %v747_v40 = vpop.f32.mrf.mxu1 }
 0x2ba   : > { %v519_v43 = vadd.f32 0.5, %v501_v39  ;;  %v516_v44 = vadd.f32 %v747_v40, %v420_v38  ;;  %v524_v48 = vmax.f32 %v520_v42, 0.0 }
 0x2bb   : > { %v510_v45 = vpop.f32.mrf.mxu1 }
 0x2bc   : > { %v523_v46 = vmax.f32 %v519_v43, 0.0  ;;  %v511_v47 = vadd.f32 %v510_v45, %v419_v41  ;;  %v522_v49 = vadd.f32 0.5, %v516_v44  ;;  %v528_v53 = vmin.f32 %v524_v48, 1.0 }
 0x2be   : > { %v521_v50 = vadd.f32 0.5, %v511_v47  ;;  %v527_v51 = vmin.f32 %v523_v46, 1.0  ;;  %v526_v54 = vmax.f32 %v522_v49, 0.0 }
 0x2c0   : > { %v525_v52 = vmax.f32 %v521_v50, 0.0  ;;  %533 = vperm.xlu0 %802, %v527_v51   ;;  %v530_v56 = vmin.f32 %v526_v54, 1.0 }
 0x2c2   : > { %v529_v55 = vmin.f32 %v525_v52, 1.0 }
 0x2c4   : > { %543 = vperm.xlu1 %803, %v529_v55   ;;  %538 = vperm.xlu0 %802, %v528_v53  }
 0x2c8   : > { %548 = vperm.xlu1 %803, %v530_v56  }
 0x33b   : > { %v534_v57 = vpop.permute.xlu0 %533 }
 0x33c   : > { %v551_v58 = vmul.f32 %v534_v57, %v1052_v2  ;;  %v552_v59 = vmul.f32 %v534_v57, %v1048_v1 }
 0x33e   : > { %559 = vst [vmem:[%s242_s7] sm:$0xff] %v551_v58  ;;  %560 = vst [vmem:[%s242_s7 + $0x8] sm:$0xff] %v552_v59 }
 0x33f   : > { %v544_v60 = vpop.permute.xlu1 %543  ;;  %v539_v61 = vpop.permute.xlu0 %538 }
 0x340   : > { %v555_v62 = vmul.f32 %v544_v60, %v1068_v6  ;;  %v556_v63 = vmul.f32 %v544_v60, %v1063_v5  ;;  %v553_v0 = vmul.f32 %v539_v61, %v1060_v4  ;;  %v554_v9 = vmul.f32 %v539_v61, %v1055_v3 }
 0x342   : > { %563 = vst [vmem:[%s242_s7 + $0x20] sm:$0xff] %v555_v62  ;;  %564 = vst [vmem:[%s242_s7 + $0x28] sm:$0xff] %v556_v63 }
 0x343   : > { %561 = vst [vmem:[%s242_s7 + $0x10] sm:$0xff] %v553_v0  ;;  %562 = vst [vmem:[%s242_s7 + $0x18] sm:$0xff] %v554_v9  ;;  %v549_v1 = vpop.permute.xlu1 %548 }
 0x344   : > { %v557_v2 = vmul.f32 %v549_v1, %v1076_v8  ;;  %v558_v3 = vmul.f32 %v549_v1, %v1071_v7 }
 0x346   : > { %565 = vst [vmem:[%s242_s7 + $0x30] sm:$0xff] %v557_v2  ;;  %566 = vst [vmem:[%s242_s7 + $0x38] sm:$0xff] %v558_v3 }
 0x347   : > { %845 = shalt.err (!%p842_p10)
}
 0x348   : > { %s846_s12 = scalar_lea.hbm %s1123_s13, 1024  ;;  %s850_s16 = scalar_lea.hbm %s1173_s5, 2048 }
 0x349   : > { %p847_p0 = scmp.ne.s32.totalorder %s1123_s13, %s846_s12  ;;  %p851_p1 = scmp.lt.s32.totalorder %s1123_s13, %s1173_s5 }
 0x34a   : > { %p852_p3 = scmp.lt.s32.totalorder %s850_s16, %s846_s12 }
 0x34b   : > { %p848_p2 = pnand %p847_p0, %p1182_p12 }
 0x34c   : > { %p853_p6 = por %p852_p3, %p851_p1 }
 0x34d   : > { %p849_p9 = pneg %p848_p2 }
 0x34f   : > { %p854_p11 = pnand %p853_p6, %p849_p9 }
 0x351   : > { %857 = shalt.err (!%p854_p11)
}
 0x352   : > { %s906_s10 = smov 256   ;;  %s907_s25 = smov 16  }
 0x353   : > { %750 = dma.vmem_to_hbm [thread:$0]  (%p1182_p12), %s1118_s9, 1024, %s1123_s13, %s568_s22, %s906_s10, %s906_s10, %s907_s25  }
 0x354 PF: > { %s596_s11 = sand.u32 1, %s884_s18   ;;  %p1183_p13 = scmp.ne.s32.totalorder %s1179_s6, 0 }
 0x355   : > { %p1184_p4 = scmp.ge.s32.totalorder %s896_s21, 2  ;;  %s597_s17 = scalar_lea.sflag [#allocation4], %s596_s11 }
 0x357   : > { %p757_p5 = pnand %p1184_p4, %p1183_p13 }
 0x359   : > { %p758_p7 = pneg %p757_p5 }
 0x35b   : > { %879 = dma.done.wait (%p758_p7), %s597_s17, 1024  }
 0x35c   : > { %881 = vsyncadd (%p758_p7), %s597_s17, 4294966272  ;;  %p18_p8 = scmp.ge.s32.totalorder %s963_s24, 4   ;;  %s1185_s18 = smov %s888_s19 }
 0x35d   : > { %s1186_s19 = smov %s892_s20  ;;  %s1187_s20 = smov %s975_s27 }
 0x35e   : > { %s1188_s21 = smov %s963_s24  ;;  %20 = sbr.rel (!%p18_p8) target bundleno = 5 (0x5), region = 85 }
 0x363   :  { %602 = vsyncpa [#allocation3], 1 }
 0x364   :  { %604 = vsyncpa [#allocation3 + $0x1], 1 }
 0x365   :  { %605 = vsyncpa [#allocation4], 1 }
 0x366   :  { %607 = vsyncpa [#allocation4 + $0x1], 1 }

</bundles_post_ra>
